<compile_context>
chip_gen: v6e
topology: v6e:2x2x1
jax: 0.10.0
libtpu: 0.0.40
codegen_flags: <defaults>
</compile_context>

<pallas_src>
import functools

import jax
import jax.numpy as jnp
from jax.experimental import pallas as pl
from jax.experimental.pallas import tpu as pltpu


# ----------------------------------- kernel ---------------------------------------

def _gn1_kernel(x_ref, g_ref, b_ref, o_ref, *, eps):
    """GroupNorm(num_groups=1) over a block of TN complete samples.

    x_ref/o_ref : (TN, R, L)   per-sample stats reduce over axes (1, 2)
    g_ref/b_ref : (R, K), K in {1, L}   pre-expanded affine params (f32)
    """
    x = x_ref[...].astype(jnp.float32)                                   # stats in f32
    mean = jnp.mean(x, axis=(1, 2), keepdims=True)                       # (TN,1,1)
    # Two-pass variance on x (biased, matching PyTorch GroupNorm); the (x - mean)
    # temp only feeds the reduction and is not kept live for the output.
    var = jnp.mean(jnp.square(x - mean), axis=(1, 2), keepdims=True)     # (TN,1,1)
    inv = jax.lax.rsqrt(var + eps)                                       # (TN,1,1)
    a = g_ref[...][None] * inv                                           # scale
    c = b_ref[...][None] - mean * a                                      # shift
    o_ref[...] = (x * a + c).astype(o_ref.dtype)                         # o = x*a + c


# ------------------------------ pallas_call wrapper --------------------------------

def _pick_tn(n, bytes_per_sample, target=1 << 20):
    """Samples per grid step: ~1 MiB blocks, but keep >= 2 steps for v7x's 2 TCs."""
    tn = max(1, min(n, target // max(1, bytes_per_sample)))
    if n >= 2:
        tn = min(tn, n // 2)
    tn = max(1, tn)
    while n % tn:          # avoid partial blocks
        tn -= 1
    return tn


def groupnorm1(x_nchw, gamma, beta, *, eps=1e-5):
    """GroupNorm(num_groups=1, num_channels=C) on an NCHW tensor via one Pallas kernel."""
    N, C, H, W = x_nchw.shape
    HW = H * W
    total = C * HW
    dt = x_nchw.dtype
    g32 = gamma.astype(jnp.float32)
    b32 = beta.astype(jnp.float32)

    if total % 128 == 0:
        # Lane-dense flat view of each sample (free row-major reshape).
        R, L = total // 128, 128
        x3 = x_nchw.reshape(N, R, L)
        if HW % 128 == 0:
            # each 128-lane row lies within one channel -> per-row (sublane) broadcast
            rpc = HW // 128
            g2 = jnp.repeat(g32, rpc).reshape(R, 1)
            b2 = jnp.repeat(b32, rpc).reshape(R, 1)
        else:
            # channels interleave within rows -> per-element expansion (still lane-dense)
            g2 = jnp.broadcast_to(g32[:, None], (C, HW)).reshape(R, L)
            b2 = jnp.broadcast_to(b32[:, None], (C, HW)).reshape(R, L)
    else:
        # Fallback: per-channel (C, HW) layout, legal for any shape.
        # TODO(synk): HW < 128 here means masked (partial-lane) stores.
        R, L = C, HW
        x3 = x_nchw.reshape(N, R, L)
        g2 = g32.reshape(C, 1)
        b2 = b32.reshape(C, 1)

    itemsize = jnp.dtype(dt).itemsize
    TN = _pick_tn(N, R * L * itemsize)
    grid = (N // TN,)

    # Double-buffered in+out blocks + f32 compute temps + params, with headroom;
    # above v5e's 16 MiB default scoped limit, well under v7x's 64 MiB physical VMEM.
    vmem_limit = int(min(48 * 2**20, max(16 * 2**20, 6 * TN * R * L * 4 + (2 << 20))))

    cost = pl.CostEstimate(
        flops=5 * N * total,
        transcendentals=N,
        bytes_accessed=2 * N * total * itemsize + 2 * g2.size * 4,
    )

    kern = functools.partial(_gn1_kernel, eps=float(eps))
    y = pl.pallas_call(
        kern,
        out_shape=jax.ShapeDtypeStruct((N, R, L), dt),
        grid=grid,
        in_specs=[
            pl.BlockSpec((TN, R, L), lambda i: (i, 0, 0)),
            pl.BlockSpec(g2.shape, lambda i: (0, 0)),
            pl.BlockSpec(b2.shape, lambda i: (0, 0)),
        ],
        out_specs=pl.BlockSpec((TN, R, L), lambda i: (i, 0, 0)),
        compiler_params=pltpu.CompilerParams(
            dimension_semantics=("parallel",),
            vmem_limit_bytes=vmem_limit,
        ),
        cost_estimate=cost,
    )(x3, g2, b2)
    return y.reshape(N, C, H, W)


def prenorm(x_nchw, gamma, beta, fn=None, *, eps=1e-5):
    """PreNorm.forward: fn(GroupNorm(1, dim)(x)).

    `fn` is the arbitrary wrapped sub-module of PreNorm; here it is any JAX callable
    applied to the Pallas-normalized activations (identity if None).
    """
    y = groupnorm1(x_nchw, gamma, beta, eps=eps)
    # TODO(synk): `self.fn` is an arbitrary nn.Module (attention/conv/...); when it is
    # itself a Pallas kernel, fuse this scale/shift into its input pipeline to avoid
    # the HBM round-trip of the normalized tensor.
    return y if fn is None else fn(y)


# --------------------------------- reference ---------------------------------------

def _ref_groupnorm1(x, gamma, beta, eps=1e-5):
    x = x.astype(jnp.float32)
    mean = x.mean(axis=(1, 2, 3), keepdims=True)
    var = jnp.square(x - mean).mean(axis=(1, 2, 3), keepdims=True)
    xn = (x - mean) / jnp.sqrt(var + eps)
    return xn * gamma[None, :, None, None] + beta[None, :, None, None]


# ------------------------------------ main ------------------------------------------

if __name__ == "__main__":
    B, C, H, W = 2, 4, 16, 16

    key = jax.random.PRNGKey(0)
    k_x, k_g, k_b = jax.random.split(key, 3)

    x = jax.random.normal(k_x, (B, C, H, W), dtype=jnp.float32)       # NCHW, as PyTorch
    gamma = 1.0 + 0.1 * jax.random.normal(k_g, (C,), dtype=jnp.float32)
    beta = 0.1 * jax.random.normal(k_b, (C,), dtype=jnp.float32)

    # f32 path (PyTorch default dtype)
    out = prenorm(x, gamma, beta)            # fn = identity for the demo
    jax.block_until_ready(out)
    ref = _ref_groupnorm1(x, gamma, beta)
    assert out.shape == (B, C, H, W)
    assert out.dtype == x.dtype
    assert jnp.allclose(out, ref, atol=1e-4, rtol=1e-4), float(jnp.max(jnp.abs(out - ref)))

    # bf16 path: input dtype is preserved end-to-end (no forced f32 round-trip)
    x_bf16 = x.astype(jnp.bfloat16)
    out_bf16 = prenorm(x_bf16, gamma, beta)
    jax.block_until_ready(out_bf16)
    ref_bf16 = _ref_groupnorm1(x_bf16, gamma, beta)
    assert out_bf16.dtype == jnp.bfloat16
    assert jnp.allclose(out_bf16.astype(jnp.float32), ref_bf16, atol=3e-2, rtol=3e-2)

    print("KERNEL_OK")
</pallas_src>

<mosaic_0001>
module attributes {stable_mosaic.version = 11 : i64} {
  func.func @_gn1_kernel(%arg0: i32, %arg1: memref<1x8x128xf32, #tpu.memory_space<vmem>>, %arg2: memref<8x1xf32, #tpu.memory_space<vmem>>, %arg3: memref<8x1xf32, #tpu.memory_space<vmem>>, %arg4: memref<1x8x128xf32, #tpu.memory_space<vmem>>) attributes {dimension_semantics = [#tpu.dimension_semantics<parallel>], iteration_bounds = array<i64: 2>, scalar_prefetch = 0 : i64, scratch_operands = 0 : i64, tpu.core_type = #tpu.core_type<tc>, window_params = [{transform_indices = @transform_0, window_bounds = array<i64: 1, 8, 128>}, {pipeline_mode = #tpu.pipeline_mode<synchronous>, transform_indices = @transform_1, window_bounds = array<i64: 8, 1>}, {pipeline_mode = #tpu.pipeline_mode<synchronous>, transform_indices = @transform_2, window_bounds = array<i64: 8, 1>}, {transform_indices = @transform_3, window_bounds = array<i64: 1, 8, 128>}]} {
    %c0 = arith.constant 0 : index
    %c0_0 = arith.constant 0 : index
    %c0_1 = arith.constant 0 : index
    %0 = vector.load %arg1[%c0, %c0_0, %c0_1] : memref<1x8x128xf32, #tpu.memory_space<vmem>>, vector<1x8x128xf32>
    %cst = arith.constant dense<0.000000e+00> : vector<1xf32>
    %1 = vector.multi_reduction <add>, %0, %cst [1, 2] : vector<1x8x128xf32> to vector<1xf32>
    %2 = vector.shape_cast %1 : vector<1xf32> to vector<1x1x1xf32>
    %cst_2 = arith.constant 1.024000e+03 : f32
    %3 = vector.broadcast %cst_2 : f32 to vector<1x1x1xf32>
    %4 = arith.divf %2, %3 : vector<1x1x1xf32>
    %5 = vector.broadcast %4 : vector<1x1x1xf32> to vector<1x8x128xf32>
    %6 = arith.subf %0, %5 : vector<1x8x128xf32>
    %7 = arith.mulf %6, %6 : vector<1x8x128xf32>
    %cst_3 = arith.constant dense<0.000000e+00> : vector<1xf32>
    %8 = vector.multi_reduction <add>, %7, %cst_3 [1, 2] : vector<1x8x128xf32> to vector<1xf32>
    %9 = vector.shape_cast %8 : vector<1xf32> to vector<1x1x1xf32>
    %cst_4 = arith.constant 1.024000e+03 : f32
    %10 = vector.broadcast %cst_4 : f32 to vector<1x1x1xf32>
    %11 = arith.divf %9, %10 : vector<1x1x1xf32>
    %cst_5 = arith.constant 9.99999974E-6 : f32
    %12 = vector.broadcast %cst_5 : f32 to vector<1x1x1xf32>
    %13 = arith.addf %11, %12 : vector<1x1x1xf32>
    %14 = math.rsqrt %13 : vector<1x1x1xf32>
    %c0_6 = arith.constant 0 : index
    %c0_7 = arith.constant 0 : index
    %15 = vector.load %arg2[%c0_6, %c0_7] : memref<8x1xf32, #tpu.memory_space<vmem>>, vector<8x1xf32>
    %16 = vector.shape_cast %15 : vector<8x1xf32> to vector<1x8x1xf32>
    %17 = vector.broadcast %14 : vector<1x1x1xf32> to vector<1x8x1xf32>
    %18 = arith.mulf %16, %17 : vector<1x8x1xf32>
    %c0_8 = arith.constant 0 : index
    %c0_9 = arith.constant 0 : index
    %19 = vector.load %arg3[%c0_8, %c0_9] : memref<8x1xf32, #tpu.memory_space<vmem>>, vector<8x1xf32>
    %20 = vector.shape_cast %19 : vector<8x1xf32> to vector<1x8x1xf32>
    %21 = vector.broadcast %4 : vector<1x1x1xf32> to vector<1x8x1xf32>
    %22 = arith.mulf %21, %18 : vector<1x8x1xf32>
    %23 = arith.subf %20, %22 : vector<1x8x1xf32>
    %24 = vector.broadcast %18 : vector<1x8x1xf32> to vector<1x8x128xf32>
    %25 = arith.mulf %0, %24 : vector<1x8x128xf32>
    %26 = vector.broadcast %23 : vector<1x8x1xf32> to vector<1x8x128xf32>
    %27 = arith.addf %25, %26 : vector<1x8x128xf32>
    %c0_10 = arith.constant 0 : index
    %c0_11 = arith.constant 0 : index
    %c0_12 = arith.constant 0 : index
    %28 = vector.load %arg4[%c0_10, %c0_11, %c0_12] : memref<1x8x128xf32, #tpu.memory_space<vmem>>, vector<1x8x128xf32>
    tpu.vector_store %arg4[%c0_10, %c0_11, %c0_12], %27 {strides = array<i32>} : memref<1x8x128xf32, #tpu.memory_space<vmem>>, vector<1x8x128xf32>,
    return
  }
  func.func @transform_0(%arg0: i32) -> (i32, i32, i32) {
    %c0_i32 = arith.constant 0 : i32
    %c0_i32_0 = arith.constant 0 : i32
    %c0_i32_1 = arith.constant 0 : i32
    return %arg0, %c0_i32, %c0_i32_0 : i32, i32, i32
  }
  func.func @transform_1(%arg0: i32) -> (i32, i32) {
    %c0_i32 = arith.constant 0 : i32
    %c0_i32_0 = arith.constant 0 : i32
    %c0_i32_1 = arith.constant 0 : i32
    return %c0_i32, %c0_i32_0 : i32, i32
  }
  func.func @transform_2(%arg0: i32) -> (i32, i32) {
    %c0_i32 = arith.constant 0 : i32
    %c0_i32_0 = arith.constant 0 : i32
    %c0_i32_1 = arith.constant 0 : i32
    return %c0_i32, %c0_i32_0 : i32, i32
  }
  func.func @transform_3(%arg0: i32) -> (i32, i32, i32) {
    %c0_i32 = arith.constant 0 : i32
    %c0_i32_0 = arith.constant 0 : i32
    %c0_i32_1 = arith.constant 0 : i32
    return %arg0, %c0_i32, %c0_i32_0 : i32, i32, i32
  }
}

</mosaic_0001>

<bundles_post_ra>
// kernel: tpu_custom_call.1
= control target key start
LH: loop header
LB: loop body
LE: loop exit
PB: predicated region body
PF: predicated region fallthrough
CT: control target
= control target key end

     0   :  { %8 = vsyncpa [#allocation3], 0  ;;  %s512_s0 = inlined_call_operand.vmem [shape: f32[2,8,128], index: 0, kind: input, shape index: {}]   ;;  %s513_s1 = inlined_call_operand.vmem [shape: f32[8,1], index: 1, kind: input, shape index: {}]   ;;  %s514_s2 = inlined_call_operand.vmem [shape: f32[8,1], index: 2, kind: input, shape index: {}]   ;;  %s515_s3 = inlined_call_operand.hbm [shape: f32[2,8,128], index: 3, kind: output, shape index: {}]  }
   0x1   :  { %10 = vsyncpa [#allocation3 + $0x1], 0  ;;  %s419_s12 = smov 0   ;;  %s421_s13 = smov 0  }
   0x2   :  { %s423_s14 = smov 0   ;;  %s425_s15 = smov 0  }
   0x3 LB: > { %s440_s16 = sadd.s32 4294967295, %s395_s15   ;;  %s281_s17 = sadd.s32 4294967294, %s395_s15   ;;  %s395_s15 = sphi %s425_s15, %s521_s15   ;;  %s391_s14 = sphi %s423_s14, %s520_s14   ;;  %s387_s13 = sphi %s421_s13, %s519_s13   ;;  %s383_s12 = sphi %s419_s12, %s518_s12  }
   0x4   : > { %s444_s18 = sadd.s32 1, %s395_s15   ;;  %s91_s19 = sadd.s32 1, %s391_s14 }
   0x5   : > { %s88_s20 = ssub.s32 %s395_s15, %s444_s18  ;;  %p101_p0 = scmp.ne.s32.totalorder %s391_s14, %s387_s13 }
   0x6   : > { %p89_p1 = scmp.eq.s32.totalorder %s88_s20, 0  ;;  %p102_p2 = scmp.eq.s32.totalorder %s440_s16, 1 }
   0x7   : > { %p107_p3 = scmp.ne.s32.totalorder %s387_s13, %s383_s12  ;;  %p108_p4 = scmp.eq.s32.totalorder %s281_s17, 1 }
   0x8   : > { %s455_s21 = scalar_select %p89_p1, %s391_s14, %s91_s19  }
   0x9   : > { %p457_p5 = por %p102_p2, %p101_p0  ;;  %p461_p6 = por %p108_p4, %p107_p3 }
   0xa   : > { %p284_p7 = scmp.ge.s32.totalorder %s395_s15, 1  ;;  %p139_p8 = scmp.lt.s32.totalorder %s395_s15, 3 }
   0xc   : > { %p140_p9 = pnand %p284_p7, %p139_p8 }
   0xd   : > { %p162_p10 = scmp.lt.s32.totalorder (!%p140_p9), %s440_s16, 1  ;;  %s159_s6 = sand.u32 (!%p140_p9), 1, %s387_s13  }
   0xe   : > { %143 = sbr.rel (%p140_p9) target bundleno = 493 (0x1ed), region = 32  ;;  %s285_s7 = sshll.u32 (!%p140_p9), %s159_s6, 3 }
   0xf   : > { %s288_s8 = sshll.u32 (!%p140_p9), %s440_s16, 7  ;;  %s161_s9 = scalar_lea.vmem (!%p140_p9), [#allocation2], %s285_s7 }
  0x10   : > { %s222_s10 = sshll.u32 (!%p140_p9), %s161_s9, 4  ;;  %s220_s19 = scalar_lea.hbm (!%p140_p9), %s515_s3, %s288_s8  ;;  %s223_s10 = int_to_ptr.vmem [resolvable:$true] %s222_s10 }
  0x11   : > { %s209_s20 = scalar_lea.sflag (!%p140_p9), [#allocation3], %s159_s6 }
  0x13   : > { %s163_s24 = scalar_select %p162_p10, %s440_s16, 1  ;;  %v397_v11 = vmov 0   ;;  %v190_v21 = vld [vmem:[%s513_s1] sm:$0xff] }
  0x14   : > { %331 = vset.pattern.permute.xlu1 %v397_v11  ;;  %332 = vset.pattern.permute.xlu0 %v397_v11  ;;  %v192_v24 = vld [vmem:[%s514_s2] sm:$0xff] }
  0x15   : > { %s286_s25 = sshll.u32 %s163_s24, 3  ;;  %s335_s24 = scalar_lea.vmem %s223_s10, 128 }
  0x16   : > { %s165_s28 = scalar_lea.vmem %s512_s0, %s286_s25  ;;  %p336_p11 = scmp.ne.s32.totalorder %s223_s10, %s335_s24 }
  0x17   : > { %v166_v0 = vld [vmem:[%s165_s28] sm:$0xff]  ;;  %s398_s25 = smov [#allocation2]  }
  0x18   : > { %167 = vadd.xlane.f32.xlu0 %v166_v0  ;;  %p337_p12 = pnand %p336_p11, %p457_p5  ;;  %s339_s26 = sshll.u32 %s398_s25, 4  ;;  %s340_s26 = int_to_ptr.vmem [resolvable:$false] %s339_s26 }
  0x19   : > { %s341_s16 = scalar_lea.vmem %s340_s26, 256  ;;  %p342_p0 = scmp.lt.s32.totalorder %s223_s10, %s340_s26 }
  0x1a   : > { %p338_p13 = pneg %p337_p12  ;;  %p343_p1 = scmp.lt.s32.totalorder %s341_s16, %s335_s24 }
  0x1c   : > { %p344_p2 = por %p343_p1, %p342_p0 }
  0x1e   : > { %p345_p3 = pnand %p344_p2, %p338_p13 }
  0xa1   : > { %v168_v1 = vpop.xlane.xlu0 %167 }
  0xa2   : > { %v169_v2 = vrot.slane %v168_v1, 4 }
  0xa4   : > { %v170_v3 = vadd.f32 %v169_v2, %v168_v1 }
  0xa6   : > { %v171_v4 = vrot.slane %v170_v3, 2 }
  0xa8   : > { %v172_v5 = vadd.f32 %v171_v4, %v170_v3 }
  0xaa   : > { %v173_v6 = vrot.slane %v172_v5, 1 }
  0xac   : > { %v174_v7 = vadd.f32 %v173_v6, %v172_v5 }
  0xae   : > { %v176_v8 = vmul.f32 0.0009765625, %v174_v7 }
  0xb0   : > { %v177_v9 = vsub.f32 %v166_v0, %v176_v8 }
  0xb2   : > { %v178_v10 = vmul.f32 %v177_v9, %v177_v9 }
  0xb4   : > { %179 = vadd.xlane.f32.xlu0 %v178_v10 }
 0x13d   : > { %v180_v12 = vpop.xlane.xlu0 %179 }
 0x13e   : > { %v181_v13 = vrot.slane %v180_v12, 4 }
 0x140   : > { %v182_v14 = vadd.f32 %v181_v13, %v180_v12 }
 0x142   : > { %v183_v15 = vrot.slane %v182_v14, 2 }
 0x144   : > { %v184_v16 = vadd.f32 %v183_v15, %v182_v14 }
 0x146   : > { %v185_v17 = vrot.slane %v184_v16, 1 }
 0x148   : > { %v186_v18 = vadd.f32 %v185_v17, %v184_v16 }
 0x14a   : > { %v187_v19 = vmul.f32 0.0009765625, %v186_v18 }
 0x14c   : > { %v188_v20 = vadd.f32 1e-05, %v187_v19 }
 0x14e   : > { %333 = vrsqrt.f32 %v188_v20 }
 0x15b   : > { %v334_v22 = vpop.eup %333 }
 0x15c   : > { %v191_v23 = vmul.f32 %v334_v22, %v190_v21 }
 0x15e   : > { %197 = vperm.xlu1 %331, %v191_v23   ;;  %v193_v25 = vmul.f32 %v191_v23, %v176_v8 }
 0x160   : > { %v194_v26 = vsub.f32 %v192_v24, %v193_v25 }
 0x162   : > { %203 = vperm.xlu1 %331, %v194_v26  }
 0x1d9   : > { %v198_v27 = vpop.permute.xlu1 %197 }
 0x1da   : > { %v200_v28 = vmul.f32 %v198_v27, %v166_v0 }
 0x1dd   : > { %v204_v29 = vpop.permute.xlu1 %203 }
 0x1de   : > { %v206_v30 = vadd.f32 %v204_v29, %v200_v28 }
 0x1e0   : > { %207 = vst [vmem:[%s161_s9] sm:$0xff] %v206_v30 }
 0x1e1   : > { %348 = shalt.err (!%p345_p3)
}
 0x1e2   : > { %s349_s27 = scalar_lea.hbm %s220_s19, 128  ;;  %s353_s30 = scalar_lea.hbm %s515_s3, 256 }
 0x1e3   : > { %p350_p4 = scmp.ne.s32.totalorder %s220_s19, %s349_s27  ;;  %p354_p9 = scmp.lt.s32.totalorder %s220_s19, %s515_s3 }
 0x1e4   : > { %p355_p10 = scmp.lt.s32.totalorder %s353_s30, %s349_s27 }
 0x1e5   : > { %p351_p7 = pnand %p350_p4, %p457_p5 }
 0x1e6   : > { %p356_p11 = por %p355_p10, %p354_p9 }
 0x1e7   : > { %p352_p8 = pneg %p351_p7 }
 0x1e9   : > { %p357_p12 = pnand %p356_p11, %p352_p8 }
 0x1eb   : > { %360 = shalt.err (!%p357_p12)
}
 0x1ec   : > { %291 = dma.vmem_to_hbm [thread:$0]  (%p457_p5), %s223_s10, 128, %s220_s19, %s209_s20  }
 0x1ed PF: > { %p297_p13 = scmp.ge.s32.totalorder %s395_s15, 2  ;;  %s234_s6 = sand.u32 1, %s383_s12  }
 0x1ee   : > { %s235_s7 = scalar_lea.sflag [#allocation3], %s234_s6 }
 0x1ef   : > { %p294_p0 = pnand %p297_p13, %p461_p6 }
 0x1f1   : > { %p295_p1 = pneg %p294_p0 }
 0x1f3   : > { %378 = dma.done.wait (%p295_p1), %s235_s7, 128  }
 0x1f4   : > { %380 = vsyncadd (%p295_p1), %s235_s7, 4294967168  ;;  %p13_p2 = scmp.ge.s32.totalorder %s444_s18, 4   ;;  %s518_s12 = smov %s387_s13 }
 0x1f5   : > { %s519_s13 = smov %s391_s14  ;;  %s520_s14 = smov %s455_s21 }
 0x1f6   : > { %s521_s15 = smov %s444_s18  ;;  %15 = sbr.rel (!%p13_p2) target bundleno = 3 (0x3), region = 67 }
 0x1fb   :  { %240 = vsyncpa [#allocation3], 1 }
 0x1fc   :  { %242 = vsyncpa [#allocation3 + $0x1], 1 }

</bundles_post_ra>
